<compile_context>
chip_gen: v7x
topology: tpu7x:2x2x1
jax: 0.10.0
libtpu: 0.0.40
codegen_flags: <defaults>
</compile_context>

<pallas_src>
import functools

import jax
import jax.numpy as jnp
from jax import lax
from jax.experimental import pallas as pl
from jax.experimental.pallas import tpu as pltpu


def _round_up(n: int, m: int) -> int:
    return (n + m - 1) // m * m


def _vmem_capacity_bytes() -> int:
    """Physical VMEM per core; conservative fallback if query unavailable."""
    try:
        info = pltpu.get_tpu_info()
        cap = getattr(info, "vmem_capacity_bytes", None)
        if cap:
            return int(cap)
    except Exception:
        pass
    return 64 * 1024 * 1024  # assume the smallest (v7x per-TensorCore)


def _rmsnorm_kernel(x_ref, scale_ref, o_ref, *, eps: float, inv_hidden: float,
                    hidden: int, chunk: int, n_chunks: int, mask_hidden: bool):
    """x_ref: (row_tile, H) block; scale_ref: (1, H) (resident); o_ref: (row_tile, H)."""
    rows = x_ref.shape[0]

    if n_chunks == 1:
        # Small / unaligned hidden sizes: single-shot path.
        x32 = x_ref[...].astype(jnp.float32)
        if mask_hidden:
            # H % 128 != 0: zero anything living in the physical lane padding
            # so it cannot contribute to the reduction.
            col = lax.broadcasted_iota(jnp.int32, x32.shape, 1)
            x32 = jnp.where(col < hidden, x32, 0.0)
        sum_sq = jnp.sum(x32 * x32, axis=-1, keepdims=True)
        inv_rms = lax.rsqrt(sum_sq * inv_hidden + eps)
        y = (x32 * inv_rms) * scale_ref[...].astype(jnp.float32)
        o_ref[...] = y.astype(o_ref.dtype)
    else:
        # Large hidden sizes (chunk | H, chunk % 128 == 0): keep f32
        # temporaries chunk-sized instead of full-tile (VMEM pressure on v7x).
        unroll = n_chunks <= 16

        def ssq_body(c, acc):
            start = pl.multiple_of(c * chunk, chunk)
            xc = x_ref[:, pl.ds(start, chunk)].astype(jnp.float32)
            return acc + jnp.sum(xc * xc, axis=-1, keepdims=True)

        sum_sq = lax.fori_loop(0, n_chunks, ssq_body,
                               jnp.zeros((rows, 1), jnp.float32), unroll=unroll)
        inv_rms = lax.rsqrt(sum_sq * inv_hidden + eps)

        def out_body(c, carry):
            start = pl.multiple_of(c * chunk, chunk)
            xc = x_ref[:, pl.ds(start, chunk)].astype(jnp.float32)
            sc = scale_ref[:, pl.ds(start, chunk)].astype(jnp.float32)
            o_ref[:, pl.ds(start, chunk)] = ((xc * inv_rms) * sc).astype(o_ref.dtype)
            return carry

        lax.fori_loop(0, n_chunks, out_body, 0, unroll=unroll)


def rmsnorm(x: jax.Array, scale: jax.Array, eps: float = 1e-5,
            row_tile: int | None = None) -> jax.Array:
    """RMSNorm over the last axis of x, scaled by `scale` (shape (H,))."""
    orig_shape = x.shape
    H = orig_shape[-1]
    assert scale.shape == (H,), f"scale must have shape ({H},), got {scale.shape}"

    x2d = x.reshape(-1, H)
    R = x2d.shape[0]
    itemsize = jnp.dtype(x.dtype).itemsize

    # Sublane granularity per dtype; lanes are padded physically to 128 but we
    # never pad the arrays themselves.
    sublane = {4: 8, 2: 16, 1: 32}.get(itemsize, 8)
    h_phys = _round_up(H, 128)  # physical lane footprint, used only for sizing

    # Generation-aware budgets (v5e/v6e have 128 MiB VMEM; v7x 64 MiB per TC).
    vmem_cap = _vmem_capacity_bytes()
    if vmem_cap >= 100 * 1024 * 1024:
        budget_bytes = 8 * 1024 * 1024
        vmem_limit = 96 * 1024 * 1024
    else:
        budget_bytes = 4 * 1024 * 1024
        vmem_limit = 48 * 1024 * 1024

    if row_tile is None:
        rt = (budget_bytes // (h_phys * itemsize)) // sublane * sublane
        rt = max(sublane, rt)
        # Keep >= ~8 grid steps so the single "parallel" axis can be sharded
        # across v7x's two TensorCores and still pipeline within each core.
        rt = min(rt, max(sublane, _round_up(pl.cdiv(R, 8), sublane)))
        rt = min(rt, 4096)
        row_tile = rt
    row_tile = max(sublane, _round_up(row_tile, sublane))

    grid = (pl.cdiv(R, row_tile),)  # partial last block is clipped by Pallas

    # Hidden-axis chunking: only when a 128-multiple chunk divides H exactly.
    chunk = H
    if H > 1024:
        for c in (1024, 512, 256):
            if H % c == 0:
                chunk = c
                break
    n_chunks = H // chunk
    mask_hidden = (n_chunks == 1) and (H % 128 != 0)

    scale2d = scale.reshape(1, H)

    # Advisory cost: clearly memory-bound (read x, write out, read scale once).
    cost = pl.CostEstimate(
        flops=3 * R * H,
        transcendentals=R,
        bytes_accessed=2 * R * H * itemsize + H * jnp.dtype(scale.dtype).itemsize,
    )

    out = pl.pallas_call(
        functools.partial(_rmsnorm_kernel, eps=eps, inv_hidden=1.0 / H, hidden=H,
                          chunk=chunk, n_chunks=n_chunks, mask_hidden=mask_hidden),
        out_shape=jax.ShapeDtypeStruct((R, H), x.dtype),
        grid_spec=pltpu.PrefetchScalarGridSpec(
            num_scalar_prefetch=0,
            grid=grid,
            in_specs=[
                pl.BlockSpec((row_tile, H), lambda i: (i, 0)),
                pl.BlockSpec((1, H), lambda i: (0, 0)),  # resident scale row
            ],
            out_specs=pl.BlockSpec((row_tile, H), lambda i: (i, 0)),
        ),
        compiler_params=pltpu.CompilerParams(
            dimension_semantics=("parallel",),
            vmem_limit_bytes=vmem_limit,
        ),
        cost_estimate=cost,
    )(x2d, scale2d)

    return out.reshape(orig_shape)


def rmsnorm_ref(x, scale, eps=1e-5):
    x32 = x.astype(jnp.float32)
    norm_x = jnp.mean(x32 * x32, axis=-1, keepdims=True)
    return (scale.astype(jnp.float32) * (x32 * lax.rsqrt(norm_x + eps))).astype(x.dtype)


if __name__ == "__main__":
    key = jax.random.PRNGKey(0)

    # Small shape consistent with the module: (batch, seq, hidden).
    B, S, H = 2, 8, 32
    x = jax.random.normal(key, (B, S, H), dtype=jnp.float32)
    scale = jnp.ones((H,), dtype=jnp.float32)  # matches nn.Parameter(torch.ones(size))

    out = jax.block_until_ready(rmsnorm(x, scale, eps=1e-5))
    ref = rmsnorm_ref(x, scale, eps=1e-5)
    assert out.shape == x.shape
    assert jnp.allclose(out, ref, atol=1e-5, rtol=1e-4), "f32 mismatch vs reference"

    # Ragged shape: rows not a multiple of the row tile (partial last block)
    # and hidden not a multiple of 128 (in-kernel masked reduction).
    x2 = jax.random.normal(jax.random.PRNGKey(1), (3, 17, 160), dtype=jnp.float32)
    scale2 = jax.random.normal(jax.random.PRNGKey(2), (160,), dtype=jnp.float32)
    out2 = jax.block_until_ready(rmsnorm(x2, scale2, eps=1e-5))
    ref2 = rmsnorm_ref(x2, scale2, eps=1e-5)
    assert jnp.allclose(out2, ref2, atol=1e-5, rtol=1e-4), "ragged f32 mismatch"

    # bf16 path: f32 reduction + f32 normalization, single cast at the store.
    xb = x.astype(jnp.bfloat16)
    outb = jax.block_until_ready(rmsnorm(xb, scale, eps=1e-5))
    refb = rmsnorm_ref(xb, scale, eps=1e-5)
    assert jnp.allclose(outb.astype(jnp.float32), refb.astype(jnp.float32),
                        atol=5e-2, rtol=5e-2), "bf16 mismatch vs reference"

    # Chunked hidden-axis path (H > 1024, chunk divides H).
    x3 = jax.random.normal(jax.random.PRNGKey(3), (2, 8, 2048), dtype=jnp.float32)
    scale3 = jax.random.normal(jax.random.PRNGKey(4), (2048,), dtype=jnp.float32)
    out3 = jax.block_until_ready(rmsnorm(x3, scale3, eps=1e-5))
    ref3 = rmsnorm_ref(x3, scale3, eps=1e-5)
    assert jnp.allclose(out3, ref3, atol=1e-5, rtol=1e-4), "chunked f32 mismatch"

    print("KERNEL_OK")
</pallas_src>

<mosaic_0001>
module attributes {stable_mosaic.version = 11 : i64} {
  func.func @_rmsnorm_kernel(%arg0: i32, %arg1: memref<8x32xf32, #tpu.memory_space<vmem>>, %arg2: memref<1x32xf32, #tpu.memory_space<vmem>>, %arg3: memref<8x32xf32, #tpu.memory_space<vmem>>) attributes {dimension_semantics = [#tpu.dimension_semantics<parallel>], iteration_bounds = array<i64: 2>, scalar_prefetch = 0 : i64, scratch_operands = 0 : i64, tpu.core_type = #tpu.core_type<tc>, window_params = [{transform_indices = @transform_0, window_bounds = array<i64: 8, 32>}, {pipeline_mode = #tpu.pipeline_mode<synchronous>, transform_indices = @transform_1, window_bounds = array<i64: 1, 32>}, {transform_indices = @transform_2, window_bounds = array<i64: 8, 32>}]} {
    %c0 = arith.constant 0 : index
    %c0_0 = arith.constant 0 : index
    %0 = vector.load %arg1[%c0, %c0_0] : memref<8x32xf32, #tpu.memory_space<vmem>>, vector<8x32xf32>
    %1 = tpu.iota {dimensions = array<i32: 1>} : vector<8x32xi32>
    %c32_i32 = arith.constant 32 : i32
    %2 = vector.broadcast %c32_i32 : i32 to vector<8x32xi32>
    %3 = arith.cmpi slt, %1, %2 : vector<8x32xi32>
    %cst = arith.constant 0.000000e+00 : f32
    %4 = vector.broadcast %cst : f32 to vector<8x32xf32>
    %5 = arith.select %3, %0, %4 : vector<8x32xi1>, vector<8x32xf32>
    %6 = arith.mulf %5, %5 : vector<8x32xf32>
    %cst_1 = arith.constant dense<0.000000e+00> : vector<8xf32>
    %7 = vector.multi_reduction <add>, %6, %cst_1 [1] : vector<8x32xf32> to vector<8xf32>
    %8 = vector.shape_cast %7 : vector<8xf32> to vector<8x1xf32>
    %cst_2 = arith.constant 3.125000e-02 : f32
    %9 = vector.broadcast %cst_2 : f32 to vector<8x1xf32>
    %10 = arith.mulf %8, %9 : vector<8x1xf32>
    %cst_3 = arith.constant 9.99999974E-6 : f32
    %11 = vector.broadcast %cst_3 : f32 to vector<8x1xf32>
    %12 = arith.addf %10, %11 : vector<8x1xf32>
    %13 = math.rsqrt %12 : vector<8x1xf32>
    %14 = vector.broadcast %13 : vector<8x1xf32> to vector<8x32xf32>
    %15 = arith.mulf %5, %14 : vector<8x32xf32>
    %c0_4 = arith.constant 0 : index
    %c0_5 = arith.constant 0 : index
    %16 = vector.load %arg2[%c0_4, %c0_5] : memref<1x32xf32, #tpu.memory_space<vmem>>, vector<1x32xf32>
    %17 = vector.broadcast %16 : vector<1x32xf32> to vector<8x32xf32>
    %18 = arith.mulf %15, %17 : vector<8x32xf32>
    %c0_6 = arith.constant 0 : index
    %c0_7 = arith.constant 0 : index
    %19 = vector.load %arg3[%c0_6, %c0_7] : memref<8x32xf32, #tpu.memory_space<vmem>>, vector<8x32xf32>
    tpu.vector_store %arg3[%c0_6, %c0_7], %18 {strides = array<i32>} : memref<8x32xf32, #tpu.memory_space<vmem>>, vector<8x32xf32>,
    return
  }
  func.func @transform_0(%arg0: i32) -> (i32, i32) {
    %c0_i32 = arith.constant 0 : i32
    %c0_i32_0 = arith.constant 0 : i32
    return %arg0, %c0_i32 : i32, i32
  }
  func.func @transform_1(%arg0: i32) -> (i32, i32) {
    %c0_i32 = arith.constant 0 : i32
    %c0_i32_0 = arith.constant 0 : i32
    %c0_i32_1 = arith.constant 0 : i32
    return %c0_i32, %c0_i32_0 : i32, i32
  }
  func.func @transform_2(%arg0: i32) -> (i32, i32) {
    %c0_i32 = arith.constant 0 : i32
    %c0_i32_0 = arith.constant 0 : i32
    return %arg0, %c0_i32 : i32, i32
  }
}

</mosaic_0001>

<bundles_post_ra>
// kernel: tpu_custom_call.1
= control target key start
LH: loop header
LB: loop body
LE: loop exit
PB: predicated region body
PF: predicated region fallthrough
CT: control target
= control target key end

     0   :  { %7 = vsyncpa [#allocation3], 0  ;;  %s608_s0 = inlined_call_operand.hbm [shape: f32[16,32], index: 0, kind: input, shape index: {}]   ;;  %s609_s1 = inlined_call_operand.vmem [shape: f32[1,32], index: 1, kind: input, shape index: {}]   ;;  %s610_s2 = inlined_call_operand.hbm [shape: f32[16,32], index: 2, kind: output, shape index: {}]  }
   0x1   :  { %9 = vsyncpa [#allocation3 + $0x1], 0 }
   0x2   :  { %10 = vsyncpa [#allocation4], 0 }
   0x3   :  { %12 = vsyncpa [#allocation4 + $0x1], 0  ;;  %s442_s9 = smov 0   ;;  %s444_s10 = smov 0  }
   0x4   :  { %s446_s11 = smov 0   ;;  %s448_s12 = smov 0  }
   0x5 LB: > { %s463_s13 = sadd.s32 4294967295, %s423_s12   ;;  %s266_s14 = sadd.s32 4294967294, %s423_s12   ;;  %s423_s12 = sphi %s448_s12, %s625_s12   ;;  %s419_s11 = sphi %s446_s11, %s624_s11   ;;  %s415_s10 = sphi %s444_s10, %s623_s10   ;;  %s411_s9 = sphi %s442_s9, %s622_s9  }
   0x6   : > { %s467_s15 = sadd.s32 1, %s423_s12   ;;  %s25_s16 = sadd.s32 1, %s419_s11 }
   0x7   : > { %s22_s17 = ssub.s32 %s423_s12, %s467_s15  ;;  %p32_p0 = scmp.ne.s32.totalorder %s419_s11, %s415_s10 }
   0x8   : > { %p23_p1 = scmp.eq.s32.totalorder %s22_s17, 0  ;;  %p33_p2 = scmp.eq.s32.totalorder %s423_s12, 0 }
   0x9   : > { %p38_p3 = scmp.ne.s32.totalorder %s415_s10, %s411_s9  ;;  %p39_p4 = scmp.eq.s32.totalorder %s463_s13, 0 }
   0xa   : > { %s479_s18 = scalar_select %p23_p1, %s419_s11, %s25_s16  }
   0xb   : > { %p481_p5 = por %p33_p2, %p32_p0  ;;  %p485_p6 = por %p39_p4, %p38_p3 }
   0xc   : > { %p83_p7 = scmp.eq.s32.totalorder %s463_s13, 1  ;;  %p89_p8 = scmp.eq.s32.totalorder %s266_s14, 1 }
   0xd   : > { %p291_p10 = scmp.lt.s32.totalorder %s423_s12, 2  ;;  %s112_s23 = sand.u32 1, %s419_s11  }
   0xe   : > { %p492_p11 = por %p83_p7, %p32_p0  ;;  %p496_p12 = por %p89_p8, %p38_p3 }
   0xf   : > { %s270_s24 = sshll.u32 %s423_s12, 7  ;;  %s269_s25 = sshll.u32 %s112_s23, 3 }
  0x10   : > { %s614_s21 = scalar_select %p492_p11, 1, 0 }
  0x11   : > { %s615_s22 = scalar_select %p496_p12, 1, 0 }
  0x12   : > { %s505_s28 = scalar_lea.hbm %s608_s0, %s270_s24  ;;  %s116_s29 = scalar_lea.vmem [#allocation2], %s269_s25 }
  0x13   : > { %s123_s30 = sshll.u32 %s116_s29, 4  ;;  %p509_p13 = pnand %p291_p10, %p481_p5  ;;  %s513_s30 = int_to_ptr.vmem [resolvable:$true] %s123_s30 }
  0x14   : > { %s113_s4 = scalar_lea.sflag [#allocation3], %s112_s23  ;;  %s327_s5 = scalar_lea.hbm %s505_s28, 128 }
  0x15   : > { %p328_p2 = scmp.ne.s32.totalorder %s505_s28, %s327_s5  ;;  %p329_p3 = pneg %p509_p13 }
  0x16   : > { %s332_s8 = scalar_lea.hbm %s608_s0, 256  ;;  %p333_p5 = scmp.lt.u32.totalorder %s505_s28, %s608_s0 }
  0x17   : > { %p330_p4 = pnand %p329_p3, %p328_p2  ;;  %p334_p8 = scmp.lt.u32.totalorder %s332_s8, %s327_s5 }
  0x18   : > { %p336_p9 = scmp.lt.u32.totalorder %s327_s5, %s505_s28 }
  0x19   : > { %p331_p7 = pneg %p330_p4  ;;  %p335_p10 = por %p334_p8, %p333_p5 }
  0x1b   : > { %p337_p0 = por %p336_p9, %p335_p10 }
  0x1d   : > { %p338_p1 = pnand %p337_p0, %p331_p7 }
  0x1f   : > { %341 = shalt.err (!%p338_p1)
}
  0x20   : > { %s342_s17 = scalar_lea.vmem %s513_s30, 128  ;;  %s425_s19 = smov [#allocation2]  }
  0x21   : > { %p343_p2 = scmp.ne.s32.totalorder %s513_s30, %s342_s17  ;;  %s347_s23 = sshll.u32 %s425_s19, 4  ;;  %s348_s23 = int_to_ptr.vmem [resolvable:$false] %s347_s23 }
  0x22   : > { %s349_s24 = scalar_lea.vmem %s348_s23, 256  ;;  %p350_p11 = scmp.lt.s32.totalorder %s513_s30, %s348_s23 }
  0x23   : > { %p345_p4 = pnand %p343_p2, %p329_p3  ;;  %p351_p5 = scmp.lt.s32.totalorder %s349_s24, %s342_s17 }
  0x25   : > { %p346_p12 = pneg %p345_p4  ;;  %p352_p8 = por %p351_p5, %p350_p11 }
  0x27   : > { %p353_p9 = pnand %p352_p8, %p346_p12 }
  0x29   : > { %356 = shalt.err (!%p353_p9)
}
  0x2a   : > { %286 = dma.hbm_to_vmem [thread:$0]  (!%p509_p13), %s505_s28, 128, %s513_s30, %s113_s4  }
  0x2b   : > { %p617_p0 = scmp.lt.s32.totalorder %s423_s12, 3  ;;  %p618_p1 = scmp.ge.s32.totalorder %s423_s12, 1 }
  0x2d   : > { %p129_p3 = pnand %p618_p1, %p617_p0 }
  0x2e   : > { %s547_s25 = sand.u32 (!%p129_p3), 1, %s415_s10  }
  0x2f   : > { %132 = sbr.rel (%p129_p3) target bundleno = 239 (0xef), region = 28  ;;  %s272_s26 = sshll.u32 (!%p129_p3), %s547_s25, 3 }
  0x30   : > { %s135_s27 = scalar_lea.sflag (!%p129_p3), [#allocation3], %s547_s25  ;;  %s138_s29 = scalar_lea.vmem (!%p129_p3), [#allocation2], %s272_s26 }
  0x36   : > { %402 = dma.done.wait (%p485_p6), %s135_s27, 128  }
  0x37   : > { %404 = vsyncadd (%p485_p6), %s135_s27, 4294967168  ;;  %v160_v0 = vlaneseq  ;;  %v159_v2 = vld [vmem:[%s138_s29] sm:$0xff]  ;;  %vm165_vm1 = vcmask 261120   ;;  %s276_s30 = sshll.u32 %s463_s13, 7  ;;  %s158_s3 = scalar_lea.vmem [#allocation5], %s272_s26 }
  0x38   : > { %v274_v10 = vld [vmem:[%s609_s1] ss:$0 sm:$0xff]  ;;  %s196_s4 = sshll.u32 %s158_s3, 4  ;;  %s563_s7 = scalar_lea.hbm %s610_s2, %s276_s30  ;;  %s565_s4 = int_to_ptr.vmem [resolvable:$true] %s196_s4 }
  0x39   : > { %v161_v1 = vand.u32 127, %v160_v0  ;;  %s183_s8 = scalar_lea.sflag [#allocation4], %s547_s25  ;;  %s357_s14 = scalar_lea.vmem %s565_s4, 128 }
  0x3a   : > { %p358_p6 = scmp.ne.s32.totalorder %s565_s4, %s357_s14  ;;  %p619_p11 = scmp.ne.s32.totalorder %s614_s21, 0 }
  0x3b   : > { %vm162_vm0 = vcmp.lt.s32.totalorder %v161_v1, 32  ;;  %s426_s13 = smov [#allocation5]  }
  0x3c   : > { %v163_v3 = vsel %vm162_vm0, %v159_v2, 0.0  ;;  %p359_p12 = pnand %p358_p6, %p619_p11  ;;  %s361_s16 = sshll.u32 %s426_s13, 4  ;;  %s362_s16 = int_to_ptr.vmem [resolvable:$false] %s361_s16 }
  0x3d   : > { %v164_v4 = vmul.f32 %v163_v3, %v163_v3  ;;  %s363_s17 = scalar_lea.vmem %s362_s16, 256  ;;  %p364_p7 = scmp.lt.s32.totalorder %s565_s4, %s362_s16 }
  0x3e   : > { %p360_p13 = pneg %p359_p12  ;;  %p365_p10 = scmp.lt.s32.totalorder %s363_s17, %s357_s14 }
  0x3f   : > { %v166_v5 = vsel %vm165_vm1, %v164_v4, 0.0 }
  0x40   : > { %167 = vadd.xlane.f32.xlu0 %v166_v5  ;;  %p366_p2 = por %p365_p10, %p364_p7 }
  0x42   : > { %p367_p4 = pnand %p366_p2, %p360_p13 }
  0xcd   : > { %v168_v6 = vpop.xlane.xlu0 %167 }
  0xce   : > { %v169_v7 = vmul.f32 0.03125, %v168_v6 }
  0xd0   : > { %v170_v8 = vadd.f32 1e-05, %v169_v7 }
  0xd2   : > { %325 = vrsqrt.f32 %v170_v8 }
  0xdc   : > { %v326_v9 = vpop.eup %325 }
  0xdd   : > { %v172_v11 = vmul.f32 %v326_v9, %v163_v3 }
  0xdf   : > { %v180_v12 = vmul.f32 %v274_v10, %v172_v11 }
  0xe1   : > { %181 = vst.msk [vmem:[%s158_s3] sm:$0xff] %vm165_vm1, %v180_v12 }
  0xe2   : > { %370 = shalt.err (!%p367_p4)
}
  0xe3   : > { %s371_s19 = scalar_lea.hbm %s563_s7, 128  ;;  %s375_s25 = scalar_lea.hbm %s610_s2, 256 }
  0xe4   : > { %p372_p5 = scmp.ne.s32.totalorder %s563_s7, %s371_s19  ;;  %p376_p0 = scmp.lt.u32.totalorder %s563_s7, %s610_s2 }
  0xe5   : > { %p377_p1 = scmp.lt.u32.totalorder %s375_s25, %s371_s19  ;;  %p379_p6 = scmp.lt.u32.totalorder %s371_s19, %s563_s7 }
  0xe6   : > { %p373_p8 = pnand %p372_p5, %p619_p11 }
  0xe7   : > { %p378_p3 = por %p377_p1, %p376_p0 }
  0xe8   : > { %p374_p9 = pneg %p373_p8 }
  0xe9   : > { %p380_p12 = por %p379_p6, %p378_p3 }
  0xeb   : > { %p381_p13 = pnand %p380_p12, %p374_p9 }
  0xed   : > { %384 = shalt.err (!%p381_p13)
}
  0xee   : > { %281 = dma.vmem_to_hbm [thread:$0]  (%p619_p11), %s565_s4, 128, %s563_s7, %s183_s8  }
  0xef PF: > { %s208_s29 = sand.u32 1, %s411_s9   ;;  %p620_p7 = scmp.ne.s32.totalorder %s615_s22, 0 }
  0xf0   : > { %p621_p10 = scmp.ge.s32.totalorder %s423_s12, 2  ;;  %s209_s20 = scalar_lea.sflag [#allocation4], %s208_s29 }
  0xf2   : > { %p288_p2 = pnand %p621_p10, %p620_p7 }
  0xf4   : > { %406 = dma.done.wait (!%p288_p2), %s209_s20, 128  }
  0xf5   : > { %408 = vsyncadd (!%p288_p2), %s209_s20, 4294967168  ;;  %p15_p4 = scmp.ge.s32.totalorder %s467_s15, 4   ;;  %s622_s9 = smov %s415_s10 }
  0xf6   : > { %s623_s10 = smov %s419_s11  ;;  %s624_s11 = smov %s479_s18 }
  0xf7   : > { %s625_s12 = smov %s467_s15  ;;  %17 = sbr.rel (!%p15_p4) target bundleno = 5 (0x5), region = 73 }
  0xfe   :  { %214 = vsyncpa [#allocation3], 1 }
  0xff   :  { %216 = vsyncpa [#allocation3 + $0x1], 1 }
 0x100   :  { %217 = vsyncpa [#allocation4], 1 }
 0x101   :  { %219 = vsyncpa [#allocation4 + $0x1], 1 }

</bundles_post_ra>
